<compile_context>
chip_gen: v5e
topology: v5e:2x2
jax: 0.10.0
libtpu: 0.0.40
codegen_flags: <defaults>
</compile_context>

<pallas_src>
import jax
import jax.numpy as jnp
from jax.experimental import pallas as pl
from jax.experimental.pallas import tpu as pltpu

LANES = 128
MAX_TILE_ROWS = 2048  # (2048, 128) f32 block = 1 MiB


def _linear_kernel(w_ref, b_ref, x_ref, o_ref):
    # w_ref, b_ref: SMEM scalars; x_ref / o_ref: (tile_rows, 128) VMEM slabs.
    # Elementwise FMA on the VPU; scalar broadcast from SMEM/sreg is free.
    o_ref[...] = x_ref[...] * w_ref[0] + b_ref[0]


def _linear_forward(x, weight, bias):
    """nn.Linear(1, 1) forward as a lane-dense elementwise Pallas kernel.

    x:      (B, 1)  float32
    weight: (1, 1)  float32
    bias:   (1,)    float32
    returns (B, 1)  float32
    """
    B, IN = x.shape
    OUT, IN2 = weight.shape
    assert IN == 1 and OUT == 1 and IN2 == 1, "specialized for nn.Linear(1, 1)"

    rows = pl.cdiv(B, LANES)
    pad = rows * LANES - B

    x_flat = x.reshape(B)
    if pad:
        # Only when B % 128 != 0; pads at most 127 elements.
        x_flat = jnp.pad(x_flat, (0, pad))
    x_slab = x_flat.reshape(rows, LANES)  # row-major reinterpretation (free)

    # Block = full array when it fits (any row count allowed); otherwise a
    # sublane-aligned 2048-row tile with Pallas masking the boundary block.
    tile_rows = rows if rows <= MAX_TILE_ROWS else MAX_TILE_ROWS
    grid = (pl.cdiv(rows, tile_rows),)

    out_slab = pl.pallas_call(
        _linear_kernel,
        out_shape=jax.ShapeDtypeStruct((rows, LANES), x.dtype),
        grid_spec=pl.GridSpec(
            grid=grid,
            in_specs=[
                pl.BlockSpec(memory_space=pltpu.MemorySpace.SMEM),   # weight
                pl.BlockSpec(memory_space=pltpu.MemorySpace.SMEM),   # bias
                pl.BlockSpec((tile_rows, LANES), lambda i: (i, 0)),  # x slab
            ],
            out_specs=pl.BlockSpec((tile_rows, LANES), lambda i: (i, 0)),
        ),
        compiler_params=pltpu.CompilerParams(
            dimension_semantics=("parallel",),  # megacore sharding on v7x
        ),
    )(weight.reshape(1), bias.reshape(1), x_slab)

    out_flat = out_slab.reshape(rows * LANES)
    if pad:
        out_flat = out_flat[:B]  # strip padding (only when it exists)
    return out_flat.reshape(B, OUT)


linear_forward = jax.jit(_linear_forward)


if __name__ == "__main__":
    key = jax.random.PRNGKey(0)
    kx, kw, kb = jax.random.split(key, 3)

    # Module shapes: input_size=1, output_size=1; small batch of 8.
    batch, input_size, output_size = 8, 1, 1

    x = jax.random.normal(kx, (batch, input_size), dtype=jnp.float32)
    # Deterministic parameter init (mimics nn.Linear's uniform init bounds).
    bound = 1.0 / (input_size ** 0.5)
    weight = jax.random.uniform(
        kw, (output_size, input_size), minval=-bound, maxval=bound,
        dtype=jnp.float32)
    bias = jax.random.uniform(
        kb, (output_size,), minval=-bound, maxval=bound, dtype=jnp.float32)

    out = jax.block_until_ready(linear_forward(x, weight, bias))
    ref = x @ weight.T + bias
    assert out.shape == (batch, output_size)
    assert jnp.allclose(out, ref, atol=1e-6, rtol=1e-6)

    # Second check: non-multiple-of-128 batch exercises the pad/strip path.
    x2 = jax.random.normal(kx, (2000, input_size), dtype=jnp.float32)
    out2 = jax.block_until_ready(linear_forward(x2, weight, bias))
    ref2 = x2 @ weight.T + bias
    assert out2.shape == (2000, output_size)
    assert jnp.allclose(out2, ref2, atol=1e-6, rtol=1e-6)

    # Third check: multiple-of-128 batch hits the zero-copy (no pad) path and
    # a multi-step pipelined grid with a masked boundary block.
    x3 = jax.random.normal(kx, (4096, input_size), dtype=jnp.float32)
    out3 = jax.block_until_ready(linear_forward(x3, weight, bias))
    ref3 = x3 @ weight.T + bias
    assert out3.shape == (4096, output_size)
    assert jnp.allclose(out3, ref3, atol=1e-6, rtol=1e-6)

    print("KERNEL_OK")
</pallas_src>

<mosaic_0001>
module attributes {stable_mosaic.version = 11 : i64} {
  func.func @_linear_kernel(%arg0: i32, %arg1: memref<1xf32, #tpu.memory_space<smem>>, %arg2: memref<1xf32, #tpu.memory_space<smem>>, %arg3: memref<1x128xf32, #tpu.memory_space<vmem>>, %arg4: memref<1x128xf32, #tpu.memory_space<vmem>>) attributes {dimension_semantics = [#tpu.dimension_semantics<parallel>], iteration_bounds = array<i64: 1>, scalar_prefetch = 0 : i64, scratch_operands = 0 : i64, tpu.core_type = #tpu.core_type<tc>, window_params = [{transform_indices = @transform_0, window_bounds = array<i64: 1>}, {transform_indices = @transform_1, window_bounds = array<i64: 1>}, {transform_indices = @transform_2, window_bounds = array<i64: 1, 128>}, {transform_indices = @transform_3, window_bounds = array<i64: 1, 128>}]} {
    %c0 = arith.constant 0 : index
    %c0_0 = arith.constant 0 : index
    %0 = vector.load %arg3[%c0, %c0_0] : memref<1x128xf32, #tpu.memory_space<vmem>>, vector<1x128xf32>
    %c0_1 = arith.constant 0 : index
    %1 = memref.load %arg1[%c0_1] : memref<1xf32, #tpu.memory_space<smem>>
    %2 = vector.broadcast %1 : f32 to vector<1x128xf32>
    %3 = arith.mulf %0, %2 : vector<1x128xf32>
    %c0_2 = arith.constant 0 : index
    %4 = memref.load %arg2[%c0_2] : memref<1xf32, #tpu.memory_space<smem>>
    %5 = vector.broadcast %4 : f32 to vector<1x128xf32>
    %6 = arith.addf %3, %5 : vector<1x128xf32>
    %c0_3 = arith.constant 0 : index
    %c0_4 = arith.constant 0 : index
    %7 = vector.load %arg4[%c0_3, %c0_4] : memref<1x128xf32, #tpu.memory_space<vmem>>, vector<1x128xf32>
    tpu.vector_store %arg4[%c0_3, %c0_4], %6 {strides = array<i32>} : memref<1x128xf32, #tpu.memory_space<vmem>>, vector<1x128xf32>,
    return
  }
  func.func @transform_0(%arg0: i32) -> i32 {
    %c0_i32 = arith.constant 0 : i32
    %c0_i32_0 = arith.constant 0 : i32
    return %c0_i32 : i32
  }
  func.func @transform_1(%arg0: i32) -> i32 {
    %c0_i32 = arith.constant 0 : i32
    %c0_i32_0 = arith.constant 0 : i32
    return %c0_i32 : i32
  }
  func.func @transform_2(%arg0: i32) -> (i32, i32) {
    %c0_i32 = arith.constant 0 : i32
    %c0_i32_0 = arith.constant 0 : i32
    return %arg0, %c0_i32 : i32, i32
  }
  func.func @transform_3(%arg0: i32) -> (i32, i32) {
    %c0_i32 = arith.constant 0 : i32
    %c0_i32_0 = arith.constant 0 : i32
    return %arg0, %c0_i32 : i32, i32
  }
}

</mosaic_0001>

<bundles_post_ra>
// kernel: _linear_forward.1
= control target key start
LH: loop header
LB: loop body
LE: loop exit
PB: predicated region body
PF: predicated region fallthrough
CT: control target
= control target key end

     0   :  { %s60_s0 = inlined_call_operand.<no memory space> [shape: f32[1], index: 0, kind: input, shape index: {}]   ;;  %s61_s1 = inlined_call_operand.<no memory space> [shape: f32[1], index: 1, kind: input, shape index: {}]   ;;  %s62_s2 = inlined_call_operand.vmem [shape: f32[1,128], index: 2, kind: input, shape index: {}]   ;;  %s63_s3 = inlined_call_operand.vmem [shape: f32[1,128], index: 3, kind: output, shape index: {}]  }
   0x1   :  { %v16_v0 = vld [vmem:[%s62_s2] sm:$0x1]  ;;  %v18_v1 = vstv %s60_s0  ;;  %v21_v2 = vstv %s61_s1 }
   0x2   :  { %v19_v3 = vmul.f32 %v18_v1, %v16_v0 }
   0x4   :  { %v22_v4 = vadd.f32 %v21_v2, %v19_v3 }
   0x6   :  { %23 = vst [vmem:[%s63_s3] sm:$0x1] %v22_v4 }

</bundles_post_ra>
